<compile_context>
chip_gen: v5e
topology: v5e:2x2
jax: 0.10.0
libtpu: 0.0.40
codegen_flags: <defaults>
</compile_context>

<pallas_src>
import jax
import jax.numpy as jnp
from jax.experimental import pallas as pl
from jax.experimental.pallas import tpu as pltpu

LANE = 128


def _round_up(v, m):
    return (v + m - 1) // m * m


def _matmul_bn_relu_kernel(p_ref, w_ref, scale_ref, bias_ref, o_ref):
    """One output row tile: (TM,Kp)bf16 @ (Kp,Cop)bf16 -> f32, fused BN+ReLU."""
    acc = jnp.dot(p_ref[0], w_ref[...], preferred_element_type=jnp.float32)
    y = acc * scale_ref[...] + bias_ref[...]
    o_ref[0] = jnp.maximum(y, 0.0).astype(o_ref.dtype)


def conv_bn_relu_pallas(x, weight, gamma, beta, running_mean, running_var,
                        *, stride=1, padding=0, eps=1e-5, tile_m=128):
    """Fused Conv2d(bias=False) + BatchNorm2d(eval) + ReLU.

    x: (N, Cin, H, W) f32 (PyTorch NCHW).  weight: (Cout, Cin, k, k) f32.
    Returns (N, Cout, OH, OW) f32 in NCHW.
    """
    N, Cin, H, W = x.shape
    Cout, Cin_w, k, k2 = weight.shape
    assert k == k2 and Cin_w == Cin, "groups != 1 not implemented"

    OH = (H + 2 * padding - k) // stride + 1
    OW = (W + 2 * padding - k) // stride + 1
    M = OH * OW

    KK = k * k * Cin
    Kp = _round_up(KK, LANE)         # packed-im2col contraction dim (lanes)
    Cop = _round_up(Cout, LANE)      # lane-dense output channels

    TM = min(tile_m, M)              # output row tile
    MP = _round_up(M, TM)            # padded rows so the grid divides evenly
    n_mt = MP // TM

    # ------------- one-time layout work in the wrapper (XLA) -------------
    # NCHW -> NHWC, spatial zero-pad, cast to bf16 for the MXU.
    x_nhwc = jnp.transpose(x, (0, 2, 3, 1)).astype(jnp.bfloat16)
    x_nhwc = jnp.pad(x_nhwc, ((0, 0), (padding, padding),
                              (padding, padding), (0, 0)))

    # Packed im2col (layout only, no arithmetic): concatenate the k*k shifted
    # strided views along the channel/lane axis, tap-major order (ky, kx, c).
    cols = []
    for ky in range(k):
        for kx in range(k):
            cols.append(x_nhwc[:, ky: ky + (OH - 1) * stride + 1: stride,
                                  kx: kx + (OW - 1) * stride + 1: stride, :])
    patches = jnp.concatenate(cols, axis=-1).reshape(N, M, KK)
    patches = jnp.pad(patches, ((0, 0), (0, MP - M), (0, Kp - KK)))

    # Weights: (Cout, Cin, k, k) -> (ky, kx, Cin, Cout) -> (k*k*Cin, Cout),
    # same (ky, kx, c) contraction ordering as the patches, padded, bf16.
    w = jnp.transpose(weight, (2, 3, 1, 0)).reshape(KK, Cout)
    w = jnp.pad(w, ((0, Kp - KK), (0, Cop - Cout))).astype(jnp.bfloat16)

    # Fold BatchNorm (inference / running stats) into per-channel scale+bias.
    # TODO(synk): training-mode BatchNorm (batch statistics) not implemented.
    scale = gamma / jnp.sqrt(running_var + eps)
    bias = beta - running_mean * scale
    scale = jnp.pad(scale, (0, Cop - Cout)).reshape(1, Cop).astype(jnp.float32)
    bias = jnp.pad(bias, (0, Cop - Cout)).reshape(1, Cop).astype(jnp.float32)

    out_flat = pl.pallas_call(
        _matmul_bn_relu_kernel,
        out_shape=jax.ShapeDtypeStruct((N, MP, Cop), jnp.float32),
        grid_spec=pltpu.PrefetchScalarGridSpec(
            num_scalar_prefetch=0,
            grid=(N, n_mt),
            in_specs=[
                pl.BlockSpec((1, TM, Kp), lambda n, m: (n, m, 0)),   # patches
                pl.BlockSpec((Kp, Cop), lambda n, m: (0, 0)),        # weights
                pl.BlockSpec((1, Cop), lambda n, m: (0, 0)),         # bn scale
                pl.BlockSpec((1, Cop), lambda n, m: (0, 0)),         # bn bias
            ],
            out_specs=pl.BlockSpec((1, TM, Cop), lambda n, m: (n, m, 0)),
        ),
        compiler_params=pltpu.CompilerParams(
            dimension_semantics=("parallel", "parallel")),
    )(patches, w, scale, bias)

    # Un-pad / un-flatten back to PyTorch NCHW.
    # (When chaining conv layers, return the NHWC lane-padded (N, MP, Cop)
    #  slab directly instead to avoid this extra HBM round trip.)
    out = out_flat[:, :M, :Cout].reshape(N, OH, OW, Cout)
    return jnp.transpose(out, (0, 3, 1, 2))


def reference_jax(x, weight, gamma, beta, running_mean, running_var,
                  *, stride=1, padding=0, eps=1e-5):
    """Pure-JAX reference matching Conv.forward (ispool=False, eval-mode BN)."""
    conv = jax.lax.conv_general_dilated(
        x, weight,
        window_strides=(stride, stride),
        padding=[(padding, padding), (padding, padding)],
        dimension_numbers=('NCHW', 'OIHW', 'NCHW'),
        precision=jax.lax.Precision.HIGHEST)
    scale = gamma / jnp.sqrt(running_var + eps)
    bias = beta - running_mean * scale
    y = conv * scale[None, :, None, None] + bias[None, :, None, None]
    return jnp.maximum(y, 0.0)


if __name__ == "__main__":
    # Small shapes consistent with the module: batch=2, inc=4, ouc=8,
    # spatial 16x16, k=3, s=1, p=1 (so output spatial = 16x16).
    N, Cin, Cout, H, W, k, s, p = 2, 4, 8, 16, 16, 3, 1, 1

    key = jax.random.PRNGKey(0)
    k_x, k_w, k_g, k_b, k_m, k_v = jax.random.split(key, 6)

    x = jax.random.normal(k_x, (N, Cin, H, W), jnp.float32)
    weight = jax.random.normal(k_w, (Cout, Cin, k, k), jnp.float32) / float(
        (Cin * k * k) ** 0.5)
    gamma = 1.0 + 0.1 * jax.random.normal(k_g, (Cout,), jnp.float32)
    beta = 0.1 * jax.random.normal(k_b, (Cout,), jnp.float32)
    running_mean = 0.1 * jax.random.normal(k_m, (Cout,), jnp.float32)
    running_var = 1.0 + 0.1 * jax.random.uniform(k_v, (Cout,), jnp.float32)

    out = conv_bn_relu_pallas(x, weight, gamma, beta, running_mean,
                              running_var, stride=s, padding=p)
    out = jax.block_until_ready(out)

    # The kernel feeds the MXU bf16 operands (f32 accumulation); compare
    # against the f32 reference evaluated on identically bf16-rounded inputs.
    x_r = x.astype(jnp.bfloat16).astype(jnp.float32)
    w_r = weight.astype(jnp.bfloat16).astype(jnp.float32)
    ref = reference_jax(x_r, w_r, gamma, beta, running_mean, running_var,
                        stride=s, padding=p)

    OH = (H + 2 * p - k) // s + 1
    OW = (W + 2 * p - k) // s + 1
    assert out.shape == (N, Cout, OH, OW)
    assert jnp.allclose(out, ref, atol=3e-3, rtol=3e-3), "mismatch vs JAX reference"

    print("KERNEL_OK")
</pallas_src>

<mosaic_0001>
module attributes {stable_mosaic.version = 11 : i64} {
  func.func @_matmul_bn_relu_kernel(%arg0: i32, %arg1: i32, %arg2: memref<1x128x128xbf16, #tpu.memory_space<vmem>>, %arg3: memref<128x128xbf16, #tpu.memory_space<vmem>>, %arg4: memref<1x128xf32, #tpu.memory_space<vmem>>, %arg5: memref<1x128xf32, #tpu.memory_space<vmem>>, %arg6: memref<1x128x128xf32, #tpu.memory_space<vmem>>) attributes {dimension_semantics = [#tpu.dimension_semantics<parallel>, #tpu.dimension_semantics<parallel>], iteration_bounds = array<i64: 2, 2>, scalar_prefetch = 0 : i64, scratch_operands = 0 : i64, tpu.core_type = #tpu.core_type<tc>, window_params = [{transform_indices = @transform_0, window_bounds = array<i64: 1, 128, 128>}, {pipeline_mode = #tpu.pipeline_mode<synchronous>, transform_indices = @transform_1, window_bounds = array<i64: 128, 128>}, {pipeline_mode = #tpu.pipeline_mode<synchronous>, transform_indices = @transform_2, window_bounds = array<i64: 1, 128>}, {pipeline_mode = #tpu.pipeline_mode<synchronous>, transform_indices = @transform_3, window_bounds = array<i64: 1, 128>}, {transform_indices = @transform_4, window_bounds = array<i64: 1, 128, 128>}]} {
    %c0 = arith.constant 0 : index
    %c0_0 = arith.constant 0 : index
    %c0_1 = arith.constant 0 : index
    %0 = vector.load %arg2[%c0, %c0_0, %c0_1] : memref<1x128x128xbf16, #tpu.memory_space<vmem>>, vector<1x128x128xbf16>
    %1 = vector.shape_cast %0 : vector<1x128x128xbf16> to vector<128x128xbf16>
    %c0_2 = arith.constant 0 : index
    %c0_3 = arith.constant 0 : index
    %2 = vector.load %arg3[%c0_2, %c0_3] : memref<128x128xbf16, #tpu.memory_space<vmem>>, vector<128x128xbf16>
    %cst = arith.constant dense<0.000000e+00> : vector<128x128xf32>
    %3 = tpu.matmul %1, %2, %cst {dimension_numbers = #tpu.dot_dimension_numbers<[1], [0], [0], [1], [0, 0, 1, 1], [], []>} : vector<128x128xbf16>, vector<128x128xbf16>, vector<128x128xf32> -> vector<128x128xf32>
    %c0_4 = arith.constant 0 : index
    %c0_5 = arith.constant 0 : index
    %4 = vector.load %arg4[%c0_4, %c0_5] : memref<1x128xf32, #tpu.memory_space<vmem>>, vector<1x128xf32>
    %5 = vector.broadcast %4 : vector<1x128xf32> to vector<128x128xf32>
    %6 = arith.mulf %3, %5 : vector<128x128xf32>
    %c0_6 = arith.constant 0 : index
    %c0_7 = arith.constant 0 : index
    %7 = vector.load %arg5[%c0_6, %c0_7] : memref<1x128xf32, #tpu.memory_space<vmem>>, vector<1x128xf32>
    %8 = vector.broadcast %7 : vector<1x128xf32> to vector<128x128xf32>
    %9 = arith.addf %6, %8 : vector<128x128xf32>
    %cst_8 = arith.constant 0.000000e+00 : f32
    %10 = vector.broadcast %cst_8 : f32 to vector<128x128xf32>
    %11 = arith.maximumf %9, %10 : vector<128x128xf32>
    %c0_9 = arith.constant 0 : index
    %c0_10 = arith.constant 0 : index
    %c0_11 = arith.constant 0 : index
    %12 = vector.load %arg6[%c0_9, %c0_10, %c0_11] : memref<1x128x128xf32, #tpu.memory_space<vmem>>, vector<1x128x128xf32>
    %13 = vector.shape_cast %12 : vector<1x128x128xf32> to vector<128x128xf32>
    %14 = vector.shape_cast %11 : vector<128x128xf32> to vector<1x128x128xf32>
    tpu.vector_store %arg6[%c0_9, %c0_10, %c0_11], %14 {strides = array<i32>} : memref<1x128x128xf32, #tpu.memory_space<vmem>>, vector<1x128x128xf32>,
    return
  }
  func.func @transform_0(%arg0: i32, %arg1: i32) -> (i32, i32, i32) {
    %c0_i32 = arith.constant 0 : i32
    %c0_i32_0 = arith.constant 0 : i32
    return %arg0, %arg1, %c0_i32 : i32, i32, i32
  }
  func.func @transform_1(%arg0: i32, %arg1: i32) -> (i32, i32) {
    %c0_i32 = arith.constant 0 : i32
    %c0_i32_0 = arith.constant 0 : i32
    %c0_i32_1 = arith.constant 0 : i32
    return %c0_i32, %c0_i32_0 : i32, i32
  }
  func.func @transform_2(%arg0: i32, %arg1: i32) -> (i32, i32) {
    %c0_i32 = arith.constant 0 : i32
    %c0_i32_0 = arith.constant 0 : i32
    %c0_i32_1 = arith.constant 0 : i32
    return %c0_i32, %c0_i32_0 : i32, i32
  }
  func.func @transform_3(%arg0: i32, %arg1: i32) -> (i32, i32) {
    %c0_i32 = arith.constant 0 : i32
    %c0_i32_0 = arith.constant 0 : i32
    %c0_i32_1 = arith.constant 0 : i32
    return %c0_i32, %c0_i32_0 : i32, i32
  }
  func.func @transform_4(%arg0: i32, %arg1: i32) -> (i32, i32, i32) {
    %c0_i32 = arith.constant 0 : i32
    %c0_i32_0 = arith.constant 0 : i32
    return %arg0, %arg1, %c0_i32 : i32, i32, i32
  }
}

</mosaic_0001>

<bundles_post_ra>
// kernel: tpu_custom_call.1
= control target key start
LH: loop header
LB: loop body
LE: loop exit
PB: predicated region body
PF: predicated region fallthrough
CT: control target
= control target key end

     0   :  { %s1279_s0 = inlined_call_operand.hbm [shape: bf16[2,256,128], index: 0, kind: input, shape index: {}]   ;;  %s1280_s1 = inlined_call_operand.hbm [shape: bf16[128,128], index: 1, kind: input, shape index: {}]   ;;  %s1281_s2 = inlined_call_operand.vmem [shape: f32[1,128], index: 2, kind: input, shape index: {}]   ;;  %s1282_s3 = inlined_call_operand.vmem [shape: f32[1,128], index: 3, kind: input, shape index: {}]   ;;  %s1283_s4 = inlined_call_operand.hbm [shape: f32[2,256,128], index: 4, kind: output, shape index: {}]  }
   0x1   :  { %1293 = sst [smem:[#allocation16_spill]] %s1280_s1 }
   0x2   :  { %1294 = sst [smem:[#allocation17_spill]] %s1283_s4 }
   0x3   :  { %9 = vsyncpa [#allocation3], 0 }
   0x4   :  { %11 = vsyncpa [#allocation3 + $0x1], 0 }
   0x5   :  { %12 = vsyncpa [#allocation6], 0 }
   0x6   :  { %13 = vsyncpa [#allocation4], 0 }
   0x7   :  { %15 = vsyncpa [#allocation4 + $0x1], 0  ;;  %s1034_s15 = smov 0   ;;  %s1036_s16 = smov 0  }
   0x8   :  { %s1038_s17 = smov 0   ;;  %s1040_s18 = smov 0  }
   0x9   :  { %s1042_s19 = smov 0   ;;  %s1044_s20 = smov 0  }
   0xa   :  { %s1046_s21 = smov 0   ;;  %s1048_s22 = smov 0  }
   0xb LB: > { %1295 = sst [smem:[#allocation11_spill]] %s974_s15  ;;  %s622_s23 = sadd.s32 4294967295, %s1002_s22   ;;  %s1002_s22 = sphi %s1048_s22, %s21_s22   ;;  %s998_s21 = sphi %s1046_s21, %s1321_s21   ;;  %s994_s20 = sphi %s1044_s20, %s1320_s20   ;;  %s990_s19 = sphi %s1042_s19, %s1319_s19   ;;  %s986_s18 = sphi %s1040_s18, %s1318_s18   ;;  %s982_s17 = sphi %s1038_s17, %s1317_s17   ;;  %s978_s16 = sphi %s1036_s16, %s1316_s16   ;;  %s974_s15 = sphi %s1034_s15, %s1315_s15  }
   0xc   : > { %s623_s24 = sadd.s32 4294967294, %s1002_s22   ;;  %p55_p0 = scmp.ne.s32.totalorder %s978_s16, %s974_s15 }
   0xd   : > { %p1078_p1 = scmp.eq.s32.totalorder %s622_s23, 0  ;;  %p150_p2 = scmp.eq.s32.totalorder %s623_s24, 3 }
   0xe   : > { %p624_p4 = scmp.ge.s32.totalorder %s1002_s22, 1  ;;  %p157_p6 = scmp.lt.s32.totalorder %s1002_s22, 5 }
   0xf   : > { %p1084_p3 = por %p1078_p1, %p55_p0  ;;  %p1089_p5 = por %p150_p2, %p55_p0 }
  0x10   : > { %s1300_s1 = sld [smem:[#allocation16_spill]]  ;;  %p1097_p7 = pnand %p624_p4, %p157_p6 }
  0x11   : > { %s1298_s27 = scalar_select %p1089_p5, 1, 0 }
  0x12   : > { %p753_p8 = pneg %p1097_p7  ;;  %s1004_s6 = smov [#allocation5]  }
  0x13   : > { %1299 = sst [smem:[#allocation12_spill]] %s1298_s27  ;;  %s170_s7 = sshll.u32 %s1004_s6, 4  ;;  %s171_s7 = int_to_ptr.vmem [resolvable:$true] %s170_s7 }
  0x14   : > { %p754_p9 = pnand %p753_p8, %p1078_p1  ;;  %s1284_s8 = smov 64  }
  0x15   : > { %s1285_s9 = smov 4   ;;  %s30_s10 = sadd.s32 1, %s994_s20 }
  0x16   : > { %s168_s30 = sshll.u32 %s1300_s1, 4  ;;  %p31_p10 = scmp.ge.s32.totalorder %s30_s10, 2  ;;  %s169_s30 = int_to_ptr.hbm [resolvable:$true] %s168_s30 }
  0x17   : > { %756 = dma.hbm_to_vmem [thread:$0]  (!%p754_p9), %s169_s30, 1024, %s171_s7, [#allocation6], %s1284_s8, %s1284_s8, %s1285_s9  }
  0x18   : > { %s33_s11 = sadd.s32 1, %s998_s21  ;;  %p144_p11 = scmp.eq.s32.totalorder %s622_s23, 3 }
  0x19   : > { %p49_p12 = scmp.ne.s32.totalorder %s982_s17, %s978_s16  ;;  %s1323_s10 = smov (%p31_p10, %s30_s10), 0 }
  0x1a   : > { %1302 = sst [smem:[#allocation13_spill]] %s1323_s10  ;;  %s1325_s11 = smov (!%p31_p10, %s33_s11), %s998_s21 }
  0x1b   : > { %s42_s12 = sadd.s32 1, %s982_s17  ;;  %p50_p13 = scmp.eq.s32.totalorder %s1002_s22, 0 }
  0x1c   : > { %p35_p0 = scmp.ge.s32.totalorder %s1325_s11, 2  ;;  %p1117_p2 = por %p144_p11, %p49_p12 }
  0x1d   : > { %s38_s14 = ssub.s32 %s994_s20, %s1323_s10  ;;  %p1123_p4 = por %p50_p13, %p49_p12 }
  0x1e   : > { %s1303_s13 = scalar_select %p1117_p2, 1, 0 }
  0x1f   : > { %s1327_s11 = smov (%p35_p0, %s1325_s11), 0  ;;  %p766_p6 = scmp.lt.s32.totalorder %s1002_s22, 4 }
  0x20   : > { %1304 = sst [smem:[#allocation14_spill]] %s1303_s13  ;;  %s190_s23 = sand.u32 1, %s982_s17  }
  0x21   : > { %1306 = sst [smem:[#allocation15_spill]] %s1327_s11  ;;  %s37_s28 = ssub.s32 %s998_s21, %s1327_s11 }
  0x22   : > { %s628_s29 = sshll.u32 %s994_s20, 4  ;;  %s39_s30 = sor.u32 %s38_s14, %s37_s28 }
  0x23   : > { %s627_s6 = sshll.u32 %s190_s23, 6  ;;  %p40_p8 = scmp.eq.s32.totalorder %s39_s30, 0 }
  0x24   : > { %s629_s7 = sshll.u32 %s998_s21, 5  ;;  %s194_s8 = scalar_lea.vmem [#allocation2], %s627_s6 }
  0x25   : > { %s204_s9 = sshll.u32 %s194_s8, 4  ;;  %s199_s10 = sadd.s32 %s629_s7, %s628_s29  ;;  %s205_s9 = int_to_ptr.vmem [resolvable:$true] %s204_s9 }
  0x26   : > { %s1136_s1 = scalar_select %p40_p8, %s982_s17, %s42_s12  }
  0x27   : > { %s630_s27 = sshll.u32 %s199_s10, 2  ;;  %p758_p9 = pnand %p766_p6, %p1123_p4 }
  0x28   : > { %s201_s4 = scalar_lea.hbm %s1279_s0, %s630_s27  ;;  %s191_s14 = scalar_lea.sflag [#allocation3], %s190_s23 }
  0x29   : > { %s202_s11 = sshll.u32 %s201_s4, 4  ;;  %s1307_s28 = smov 4   ;;  %s203_s11 = int_to_ptr.hbm [resolvable:$true] %s202_s11 }
  0x2a   : > { %s1308_s30 = smov 64   ;;  %216 = sbr.rel (%p1097_p7) target bundleno = 250 (0xfa), region = 36 }
  0x2b   : > { %760 = dma.hbm_to_vmem [thread:$0]  (!%p758_p9), %s203_s11, 1024, %s205_s9, %s191_s14, %s1308_s30, %s1308_s30, %s1307_s28  }
  0x2c   : > { %s1151_s8 = sand.u32 (!%p1097_p7), 1, %s978_s16  }
  0x2d   : > { %s632_s10 = sshll.u32 (!%p1097_p7), %s1151_s8, 6  ;;  %s219_s15 = scalar_lea.sflag (!%p1097_p7), [#allocation3], %s1151_s8 }
  0x2e   : > { %s1155_s27 = scalar_lea.vmem (!%p1097_p7), [#allocation2], %s632_s10 }
  0x2f   : > { %961 = dma.done.wait (%p1084_p3), %s219_s15, 1024  }
  0x30   : > { %963 = vsyncadd (%p1084_p3), %s219_s15, 4294966272 }
  0x31   : > { %965 = dma.done.wait (%p1078_p1), [#allocation6], 1024  }
  0x32   : > { %967 = vsyncadd (%p1078_p1), [#allocation6], 4294966272  ;;  %v720_v0 = vld [vmem:[#allocation5 + $0x38] sm:$0xff]  ;;  %v719_v1 = vld [vmem:[#allocation5 + $0x30] sm:$0xff]  ;;  %s634_s9 = sshll.u32 %s1151_s8, 7  ;;  %s700_s12 = sshll.u32 %s986_s18, 4 }
  0x33   : > { %383 = vmatpush.bf16.msra.mxu0 %v720_v0  ;;  %721 = vmatpush.bf16.msra.mxu1 %v720_v0  ;;  %v718_v2 = vld [vmem:[#allocation5 + $0x28] sm:$0xff]  ;;  %v717_v3 = vld [vmem:[#allocation5 + $0x20] sm:$0xff]  ;;  %v716_v4 = vld [vmem:[#allocation5 + $0x18] sm:$0xff]  ;;  %s1188_s11 = scalar_lea.vmem [#allocation7], %s634_s9  ;;  %s701_s13 = sshll.u32 %s990_s19, 5 }
  0x34   : > { %722 = vmatpush.bf16.msra.mxu2 %v720_v0  ;;  %723 = vmatpush.bf16.msra.mxu3 %v720_v0  ;;  %v715_v5 = vld [vmem:[#allocation5 + $0x10] sm:$0xff]  ;;  %v714_v6 = vld [vmem:[#allocation5 + $0x8] sm:$0xff]  ;;  %v713_v7 = vld [vmem:[#allocation5] sm:$0xff]  ;;  %s516_s24 = sadd.s32 %s701_s13, %s700_s12  ;;  %s1309_s29 = sld [smem:[#allocation17_spill]] }
  0x35   : > { %v705_v8 = vld [vmem:[%s1155_s27] sm:$0xff]  ;;  %v707_v9 = vld [vmem:[%s1155_s27 + $0x10] sm:$0xff]  ;;  %v706_v12 = vld [vmem:[%s1155_s27 + $0x8] sm:$0xff]  ;;  %s702_s18 = sshll.u32 %s516_s24, 3  ;;  %s519_s14 = sshll.u32 %s1188_s11, 4  ;;  %s520_s14 = int_to_ptr.vmem [resolvable:$true] %s519_s14 }
  0x36   : > { %v709_v10 = vld [vmem:[%s1155_s27 + $0x20] sm:$0xff]  ;;  %v711_v11 = vld [vmem:[%s1155_s27 + $0x30] sm:$0xff]  ;;  %v708_v13 = vld [vmem:[%s1155_s27 + $0x18] sm:$0xff]  ;;  %s505_s30 = scalar_lea.sflag [#allocation4], %s1151_s8 }
  0x37   : > { %384 = vmatpush.bf16.msra.mxu0 %v719_v1  ;;  %724 = vmatpush.bf16.msra.mxu1 %v719_v1  ;;  %v710_v14 = vld [vmem:[%s1155_s27 + $0x28] sm:$0xff]  ;;  %v712_v15 = vld [vmem:[%s1155_s27 + $0x38] sm:$0xff]  ;;  %v1176_v16 = vld [vmem:[%s1281_s2] ss:$0 sm:$0xff] }
  0x38   : > { %725 = vmatpush.bf16.msra.mxu2 %v719_v1  ;;  %726 = vmatpush.bf16.msra.mxu3 %v719_v1  ;;  %v1181_v17 = vld [vmem:[%s1282_s3] ss:$0 sm:$0xff] }
  0x3a   : > { %s518_s6 = scalar_lea.hbm %s1309_s29, %s702_s18  ;;  %s920_s25 = scalar_lea.hbm %s1309_s29, 512 }
  0x3b   : > { %385 = vmatpush.bf16.msra.mxu0 %v718_v2  ;;  %727 = vmatpush.bf16.msra.mxu1 %v718_v2  ;;  %s521_s28 = sshll.u32 %s518_s6, 4  ;;  %s522_s28 = int_to_ptr.hbm [resolvable:$true] %s521_s28 }
  0x3c   : > { %728 = vmatpush.bf16.msra.mxu2 %v718_v2  ;;  %729 = vmatpush.bf16.msra.mxu3 %v718_v2  ;;  %s914_s10 = sshra.s32 %s522_s28, 4  ;;  %s915_s10 = int_to_ptr.hbm [resolvable:$true] %s914_s10 }
  0x3d   : > { %s916_s15 = scalar_lea.hbm %s915_s10, 128  ;;  %p921_p10 = scmp.lt.s32.totalorder %s915_s10, %s1309_s29 }
  0x3e   : > { %p917_p1 = scmp.ne.s32.totalorder %s915_s10, %s916_s15  ;;  %p922_p11 = scmp.lt.s32.totalorder %s920_s25, %s916_s15 }
  0x3f   : > { %386 = vmatpush.bf16.msra.mxu0 %v717_v3  ;;  %730 = vmatpush.bf16.msra.mxu1 %v717_v3 }
  0x40   : > { %731 = vmatpush.bf16.msra.mxu2 %v717_v3  ;;  %732 = vmatpush.bf16.msra.mxu3 %v717_v3  ;;  %p918_p3 = pnand %p917_p1, %p1117_p2  ;;  %p923_p12 = por %p922_p11, %p921_p10 }
  0x42   : > { %p919_p7 = pneg %p918_p3 }
  0x43   : > { %387 = vmatpush.bf16.msra.mxu0 %v716_v4  ;;  %733 = vmatpush.bf16.msra.mxu1 %v716_v4 }
  0x44   : > { %734 = vmatpush.bf16.msra.mxu2 %v716_v4  ;;  %735 = vmatpush.bf16.msra.mxu3 %v716_v4  ;;  %p924_p13 = pnand %p923_p12, %p919_p7 }
  0x47   : > { %388 = vmatpush.bf16.msra.mxu0 %v715_v5  ;;  %736 = vmatpush.bf16.msra.mxu1 %v715_v5 }
  0x48   : > { %737 = vmatpush.bf16.msra.mxu2 %v715_v5  ;;  %738 = vmatpush.bf16.msra.mxu3 %v715_v5 }
  0x4b   : > { %389 = vmatpush.bf16.msra.mxu0 %v714_v6  ;;  %739 = vmatpush.bf16.msra.mxu1 %v714_v6 }
  0x4c   : > { %740 = vmatpush.bf16.msra.mxu2 %v714_v6  ;;  %741 = vmatpush.bf16.msra.mxu3 %v714_v6 }
  0x4f   : > { %390 = vmatpush.bf16.msra.mxu0 %v713_v7  ;;  %742 = vmatpush.bf16.msra.mxu1 %v713_v7 }
  0x50   : > { %743 = vmatpush.bf16.msra.mxu2 %v713_v7  ;;  %744 = vmatpush.bf16.msra.mxu3 %v713_v7 }
  0x52   : > { %391 = vmatmul.bf16.vlgmr.msra.gmra.mxu0 %v705_v8  ;;  %401 = vmatmul.bf16.vlgmr.msra.gmra.mxu1 %v707_v9 }
  0x53   : > { %411 = vmatmul.bf16.vlgmr.msra.gmra.mxu2 %v709_v10  ;;  %421 = vmatmul.bf16.vlgmr.msra.gmra.mxu3 %v711_v11 }
  0x62   : > { %396 = vmatmul.bf16.gmra.mxu0 %v706_v12  ;;  %406 = vmatmul.bf16.gmra.mxu1 %v708_v13 }
  0x63   : > { %416 = vmatmul.bf16.gmra.mxu2 %v710_v14  ;;  %426 = vmatmul.bf16.gmra.mxu3 %v712_v15 }
  0xcf   : > { %v392_v18 = vpop.f32.mrf.mxu0  ;;  %v402_v19 = vpop.f32.mrf.mxu1 }
  0xd0   : > { %v436_v20 = vmul.f32 %v1176_v16, %v392_v18  ;;  %v440_v21 = vmul.f32 %v1176_v16, %v402_v19 }
  0xd2   : > { %v456_v22 = vadd.f32 %v1181_v17, %v436_v20  ;;  %v460_v23 = vadd.f32 %v1181_v17, %v440_v21 }
  0xd4   : > { %v472_v24 = vmax.f32 %v456_v22, 0.0  ;;  %v476_v25 = vmax.f32 %v460_v23, 0.0 }
  0xd6   : > { %488 = vst [vmem:[%s1188_s11] sm:$0xff] %v472_v24  ;;  %v412_v26 = vpop.f32.mrf.mxu2  ;;  %v422_v27 = vpop.f32.mrf.mxu3 }
  0xd7   : > { %492 = vst [vmem:[%s1188_s11 + $0x20] sm:$0xff] %v476_v25  ;;  %v444_v28 = vmul.f32 %v1176_v16, %v412_v26  ;;  %v448_v29 = vmul.f32 %v1176_v16, %v422_v27  ;;  %v394_v30 = vpop.f32.mrf.mxu0  ;;  %v404_v31 = vpop.f32.mrf.mxu1 }
  0xd8   : > { %v437_v32 = vmul.f32 %v1176_v16, %v394_v30  ;;  %v441_v33 = vmul.f32 %v1176_v16, %v404_v31 }
  0xd9   : > { %v464_v34 = vadd.f32 %v1181_v17, %v444_v28  ;;  %v468_v35 = vadd.f32 %v1181_v17, %v448_v29 }
  0xda   : > { %v457_v36 = vadd.f32 %v1181_v17, %v437_v32  ;;  %v461_v37 = vadd.f32 %v1181_v17, %v441_v33 }
  0xdb   : > { %v480_v38 = vmax.f32 %v464_v34, 0.0  ;;  %v484_v39 = vmax.f32 %v468_v35, 0.0 }
  0xdc   : > { %v473_v40 = vmax.f32 %v457_v36, 0.0  ;;  %v477_v41 = vmax.f32 %v461_v37, 0.0 }
  0xdd   : > { %496 = vst [vmem:[%s1188_s11 + $0x40] sm:$0xff] %v480_v38 }
  0xde   : > { %500 = vst [vmem:[%s1188_s11 + $0x60] sm:$0xff] %v484_v39  ;;  %v414_v42 = vpop.f32.mrf.mxu2  ;;  %v424_v43 = vpop.f32.mrf.mxu3 }
  0xdf   : > { %489 = vst [vmem:[%s1188_s11 + $0x8] sm:$0xff] %v473_v40  ;;  %v445_v44 = vmul.f32 %v1176_v16, %v414_v42  ;;  %v449_v45 = vmul.f32 %v1176_v16, %v424_v43  ;;  %v397_v46 = vpop.f32.mrf.mxu0  ;;  %v407_v47 = vpop.f32.mrf.mxu1 }
  0xe0   : > { %493 = vst [vmem:[%s1188_s11 + $0x28] sm:$0xff] %v477_v41  ;;  %v438_v48 = vmul.f32 %v1176_v16, %v397_v46  ;;  %v442_v49 = vmul.f32 %v1176_v16, %v407_v47 }
  0xe1   : > { %v465_v50 = vadd.f32 %v1181_v17, %v445_v44  ;;  %v469_v51 = vadd.f32 %v1181_v17, %v449_v45 }
  0xe2   : > { %v458_v52 = vadd.f32 %v1181_v17, %v438_v48  ;;  %v462_v53 = vadd.f32 %v1181_v17, %v442_v49 }
  0xe3   : > { %v481_v54 = vmax.f32 %v465_v50, 0.0  ;;  %v485_v55 = vmax.f32 %v469_v51, 0.0 }
  0xe4   : > { %v474_v56 = vmax.f32 %v458_v52, 0.0  ;;  %v478_v57 = vmax.f32 %v462_v53, 0.0 }
  0xe5   : > { %497 = vst [vmem:[%s1188_s11 + $0x48] sm:$0xff] %v481_v54 }
  0xe6   : > { %501 = vst [vmem:[%s1188_s11 + $0x68] sm:$0xff] %v485_v55  ;;  %v417_v58 = vpop.f32.mrf.mxu2  ;;  %v427_v59 = vpop.f32.mrf.mxu3 }
  0xe7   : > { %490 = vst [vmem:[%s1188_s11 + $0x10] sm:$0xff] %v474_v56  ;;  %v446_v60 = vmul.f32 %v1176_v16, %v417_v58  ;;  %v450_v61 = vmul.f32 %v1176_v16, %v427_v59  ;;  %v399_v62 = vpop.f32.mrf.mxu0  ;;  %v409_v63 = vpop.f32.mrf.mxu1 }
  0xe8   : > { %494 = vst [vmem:[%s1188_s11 + $0x30] sm:$0xff] %v478_v57  ;;  %v439_v0 = vmul.f32 %v1176_v16, %v399_v62  ;;  %v443_v1 = vmul.f32 %v1176_v16, %v409_v63 }
  0xe9   : > { %v466_v2 = vadd.f32 %v1181_v17, %v446_v60  ;;  %v470_v3 = vadd.f32 %v1181_v17, %v450_v61 }
  0xea   : > { %v459_v4 = vadd.f32 %v1181_v17, %v439_v0  ;;  %v463_v5 = vadd.f32 %v1181_v17, %v443_v1 }
  0xeb   : > { %v482_v6 = vmax.f32 %v466_v2, 0.0  ;;  %v486_v7 = vmax.f32 %v470_v3, 0.0 }
  0xec   : > { %v475_v8 = vmax.f32 %v459_v4, 0.0  ;;  %v479_v9 = vmax.f32 %v463_v5, 0.0 }
  0xed   : > { %498 = vst [vmem:[%s1188_s11 + $0x50] sm:$0xff] %v482_v6 }
  0xee   : > { %502 = vst [vmem:[%s1188_s11 + $0x70] sm:$0xff] %v486_v7  ;;  %v419_v10 = vpop.f32.mrf.mxu2  ;;  %v429_v11 = vpop.f32.mrf.mxu3 }
  0xef   : > { %491 = vst [vmem:[%s1188_s11 + $0x18] sm:$0xff] %v475_v8  ;;  %v447_v12 = vmul.f32 %v1176_v16, %v419_v10  ;;  %v451_v13 = vmul.f32 %v1176_v16, %v429_v11 }
  0xf0   : > { %495 = vst [vmem:[%s1188_s11 + $0x38] sm:$0xff] %v479_v9 }
  0xf1   : > { %v467_v14 = vadd.f32 %v1181_v17, %v447_v12  ;;  %v471_v15 = vadd.f32 %v1181_v17, %v451_v13 }
  0xf3   : > { %v483_v18 = vmax.f32 %v467_v14, 0.0  ;;  %v487_v19 = vmax.f32 %v471_v15, 0.0 }
  0xf5   : > { %499 = vst [vmem:[%s1188_s11 + $0x58] sm:$0xff] %v483_v18 }
  0xf6   : > { %503 = vst [vmem:[%s1188_s11 + $0x78] sm:$0xff] %v487_v19 }
  0xf7   : > { %927 = shalt.err (!%p924_p13)
}
  0xf8   : > { %s1007_s8 = smov 128   ;;  %s1008_s9 = smov 8  }
  0xf9   : > { %751 = dma.vmem_to_hbm [thread:$0]  (%p1117_p2), %s520_s14, 2048, %s522_s28, %s505_s30, %s1007_s8, %s1007_s8, %s1008_s9  }
  0xfa PF: > { %s1311_s11 = sld [smem:[#allocation11_spill]]  ;;  %p768_p0 = scmp.ge.s32.totalorder %s1002_s22, 2 }
  0xfc   : > { %p762_p4 = pnand %p768_p0, %p1089_p5 }
  0xfe   : > { %p763_p6 = pneg %p762_p4 }
 0x100   : > { %s536_s13 = sand.u32 1, %s1311_s11  }
 0x101   : > { %s537_s24 = scalar_lea.sflag [#allocation4], %s536_s13 }
 0x102   : > { %969 = dma.done.wait (%p763_p6), %s537_s24, 2048  }
 0x103   : > { %971 = vsyncadd (%p763_p6), %s537_s24, 4294965248  ;;  %s21_s22 = sadd.s32 1, %s1002_s22   ;;  %s1313_s23 = sld [smem:[#allocation13_spill]] }
 0x104   : > { %p18_p8 = scmp.ge.s32.totalorder %s21_s22, 6   ;;  %s1314_s6 = sld [smem:[#allocation15_spill]] }
 0x105   : > { %s1315_s15 = smov %s978_s16  ;;  %s1316_s16 = smov %s982_s17 }
 0x106   : > { %s1317_s17 = smov %s1136_s1  ;;  %s1318_s18 = smov %s994_s20 }
 0x107   : > { %s1319_s19 = smov %s998_s21  ;;  %20 = sbr.rel (!%p18_p8) target bundleno = 11 (0xb), region = 85 }
 0x109   : > { %s1320_s20 = smov %s1313_s23 }
 0x10a   : > { %s1321_s21 = smov %s1314_s6 }
 0x10c   :  { %543 = vsyncpa [#allocation3], 1 }
 0x10d   :  { %545 = vsyncpa [#allocation3 + $0x1], 1 }
 0x10e   :  { %546 = vsyncpa [#allocation6], 1 }
 0x10f   :  { %547 = vsyncpa [#allocation4], 1 }
 0x110   :  { %549 = vsyncpa [#allocation4 + $0x1], 1 }

</bundles_post_ra>
